<compile_context>
chip_gen: v7x
topology: tpu7x:2x2x1
jax: 0.10.0
libtpu: 0.0.40
codegen_flags: <defaults>
</compile_context>

<pallas_src>
import math

import jax
import jax.numpy as jnp
from jax import lax
from jax.experimental import pallas as pl
from jax.experimental.pallas import tpu as pltpu


def _round_up(v, m):
    return (v + m - 1) // m * m


def _pad2d(a, rows, cols):
    pr, pc = rows - a.shape[0], cols - a.shape[1]
    if pr == 0 and pc == 0:
        return a
    return jnp.pad(a, ((0, pr), (0, pc)))


def _mlp_kernel(x_ref, w1_ref, b1_ref, w2_ref, b2_ref, o_ref, acc_ref):
    # x_ref : (tm, Cin)         bf16/f32 row tile
    # w1_ref: (Cin, th)  b1_ref: (1, th)   f32 bias
    # w2_ref: (th, Cout) b2_ref: (1, Cout) f32 bias
    # o_ref : (tm, Cout)        acc_ref: (tm, Cout) f32 scratch
    k = pl.program_id(1)
    nk = pl.num_programs(1)

    @pl.when(k == 0)
    def _init():
        acc_ref[...] = jnp.zeros_like(acc_ref)

    # fc1 partial: MXU consumes bf16 operands directly, accumulates in f32.
    h = jnp.dot(x_ref[...], w1_ref[...], preferred_element_type=jnp.float32)
    h = h + b1_ref[...]  # f32 bias, single broadcast per tile

    # Exact GELU (PyTorch nn.GELU default), kept in f32.
    h = 0.5 * h * (1.0 + lax.erf(h * (1.0 / math.sqrt(2.0))))

    # dropout(p=0.0) is identity -> nothing to do.

    # fc2 partial product, accumulated across hidden-dim chunks in f32.
    acc_ref[...] += jnp.dot(h.astype(w2_ref.dtype), w2_ref[...],
                            preferred_element_type=jnp.float32)

    @pl.when(k == nk - 1)
    def _finalize():
        # b2 added exactly once, on the last hidden chunk.
        o_ref[...] = (acc_ref[...] + b2_ref[...]).astype(o_ref.dtype)


def mlp_pallas(x, w1, b1, w2, b2, *, tm=256, th=None,
               compute_dtype=jnp.bfloat16, single_buffer_weights=True):
    """x: (B, N, Cin).  w1: (Cin, H), b1: (H,), w2: (H, Cout), b2: (Cout,).

    tm : row tile (256 for v6e/v7x, 128 recommended on v5e).
    th : hidden-dim tile (None = keep whole weights resident; set e.g. 512
         on v7x at large Swin dims to bound VMEM).
    compute_dtype : matmul operand dtype (bf16 default; accumulation is f32).
    """
    orig_dtype = x.dtype
    B, N, Cin = x.shape
    H = w1.shape[1]
    Cout = w2.shape[1]
    M = B * N

    if compute_dtype is None:
        compute_dtype = orig_dtype

    # --- lane-dense padding (all contraction / output dims -> mult of 128) ---
    cin_p = _round_up(Cin, 128)
    cout_p = _round_up(Cout, 128)

    tm = _round_up(min(tm, _round_up(M, 16)), 16)   # clamp tile for tiny inputs
    m_p = _round_up(M, tm)

    if th is None:
        th_eff = _round_up(H, 128)
    else:
        th_eff = min(_round_up(th, 128), _round_up(H, 128))
    h_p = _round_up(H, th_eff)
    nk = h_p // th_eff

    x2 = _pad2d(x.reshape(M, Cin), m_p, cin_p).astype(compute_dtype)
    w1p = _pad2d(w1, cin_p, h_p).astype(compute_dtype)
    w2p = _pad2d(w2, h_p, cout_p).astype(compute_dtype)
    b1p = _pad2d(b1.reshape(1, H).astype(jnp.float32), 1, h_p)
    b2p = _pad2d(b2.reshape(1, Cout).astype(jnp.float32), 1, cout_p)

    # --- explicit scoped-VMEM budget sized from the actual tiles ---
    cbytes = jnp.dtype(compute_dtype).itemsize
    act = 2 * tm * (cin_p + cout_p) * cbytes                       # x / out double-buffers
    wgt = 2 * (cin_p * th_eff + th_eff * cout_p) * cbytes          # weights (<=2 buffers)
    wgt += 2 * (th_eff + cout_p) * 4                               # biases
    f32tmp = tm * (th_eff + cout_p) * 4                            # hidden chunk + acc
    vmem_limit = int(min(max(2 * (act + wgt + f32tmp), 32 * 1024 * 1024),
                         60 * 1024 * 1024))

    grid = (m_p // tm, nk)

    def _build(weight_mode):
        wkw = {} if weight_mode is None else {"pipeline_mode": weight_mode}
        return pl.pallas_call(
            _mlp_kernel,
            out_shape=jax.ShapeDtypeStruct((m_p, cout_p), orig_dtype),
            grid_spec=pltpu.PrefetchScalarGridSpec(
                num_scalar_prefetch=0,
                grid=grid,
                in_specs=[
                    pl.BlockSpec((tm, cin_p), lambda i, k: (i, 0)),        # x rows
                    pl.BlockSpec((cin_p, th_eff), lambda i, k: (0, k), **wkw),  # w1 chunk
                    pl.BlockSpec((1, th_eff), lambda i, k: (0, k), **wkw),      # b1 chunk
                    pl.BlockSpec((th_eff, cout_p), lambda i, k: (k, 0), **wkw),  # w2 chunk
                    pl.BlockSpec((1, cout_p), lambda i, k: (0, 0), **wkw),       # b2
                ],
                out_specs=pl.BlockSpec((tm, cout_p), lambda i, k: (i, 0)),
                scratch_shapes=[pltpu.VMEM((tm, cout_p), jnp.float32)],
            ),
            compiler_params=pltpu.CompilerParams(
                dimension_semantics=("parallel", "arbitrary"),
                vmem_limit_bytes=vmem_limit,
            ),
        )(x2, w1p, b1p, w2p, b2p)

    if single_buffer_weights and nk == 1:
        # Weights/biases are grid-invariant -> one VMEM copy is enough.
        try:
            out_p = jax.block_until_ready(_build(pl.Buffered(1)))
        except Exception:
            # Fallback if this jax build rejects single-buffered operands.
            out_p = _build(None)
    else:
        out_p = _build(None)

    return out_p[:M, :Cout].reshape(B, N, Cout)


def mlp_reference(x, w1, b1, w2, b2):
    h = jnp.einsum("bnc,ch->bnh", x, w1) + b1
    h = 0.5 * h * (1.0 + lax.erf(h / math.sqrt(2.0)))
    return jnp.einsum("bnh,ho->bno", h, w2) + b2


if __name__ == "__main__":
    # Small shapes consistent with the module (hidden = mlp_ratio * in).
    B, N = 2, 8
    in_features = 32
    hidden_features = 256
    out_features = 32

    key = jax.random.PRNGKey(0)
    kx, k1, k2, k3, k4 = jax.random.split(key, 5)

    x = jax.random.normal(kx, (B, N, in_features), dtype=jnp.float32)
    w1 = jax.random.normal(k1, (in_features, hidden_features), jnp.float32) * 0.02
    b1 = jax.random.normal(k2, (hidden_features,), jnp.float32) * 0.02
    w2 = jax.random.normal(k3, (hidden_features, out_features), jnp.float32) * 0.02
    b2 = jax.random.normal(k4, (out_features,), jnp.float32) * 0.02

    y_ref = mlp_reference(x, w1, b1, w2, b2)

    # 1) f32 compute, whole weights: tight numerical check vs reference.
    y_f32 = jax.block_until_ready(
        mlp_pallas(x, w1, b1, w2, b2, compute_dtype=jnp.float32))
    assert y_f32.shape == (B, N, out_features)
    assert jnp.allclose(y_f32, y_ref, atol=1e-4, rtol=1e-4), "f32 path mismatch"

    # 2) bf16 MXU path, whole weights (default; v5e/v6e config).
    y_bf16 = jax.block_until_ready(mlp_pallas(x, w1, b1, w2, b2))
    assert jnp.allclose(y_bf16, y_ref, atol=3e-3, rtol=3e-2), "bf16 path mismatch"

    # 3) bf16 MXU path with hidden-dim tiling (v7x config; 2 H-chunks here).
    y_tiled = jax.block_until_ready(mlp_pallas(x, w1, b1, w2, b2, th=128))
    assert jnp.allclose(y_tiled, y_ref, atol=3e-3, rtol=3e-2), "H-tiled path mismatch"

    print("KERNEL_OK")
</pallas_src>

<mosaic_0001>
module attributes {stable_mosaic.version = 11 : i64} {
  func.func @_mlp_kernel(%arg0: i32, %arg1: i32, %arg2: memref<16x128xf32, #tpu.memory_space<vmem>>, %arg3: memref<128x256xf32, #tpu.memory_space<vmem>>, %arg4: memref<1x256xf32, #tpu.memory_space<vmem>>, %arg5: memref<256x128xf32, #tpu.memory_space<vmem>>, %arg6: memref<1x128xf32, #tpu.memory_space<vmem>>, %arg7: memref<16x128xf32, #tpu.memory_space<vmem>>, %arg8: memref<16x128xf32, #tpu.memory_space<vmem>>) attributes {dimension_semantics = [#tpu.dimension_semantics<parallel>, #tpu.dimension_semantics<arbitrary>], iteration_bounds = array<i64: 1, 1>, scalar_prefetch = 0 : i64, scratch_operands = 1 : i64, tpu.core_type = #tpu.core_type<tc>, window_params = [{transform_indices = @transform_0, window_bounds = array<i64: 16, 128>}, {pipeline_mode = #tpu.pipeline_mode<synchronous>, transform_indices = @transform_1, window_bounds = array<i64: 128, 256>}, {pipeline_mode = #tpu.pipeline_mode<synchronous>, transform_indices = @transform_2, window_bounds = array<i64: 1, 256>}, {pipeline_mode = #tpu.pipeline_mode<synchronous>, transform_indices = @transform_3, window_bounds = array<i64: 256, 128>}, {pipeline_mode = #tpu.pipeline_mode<synchronous>, transform_indices = @transform_4, window_bounds = array<i64: 1, 128>}, {transform_indices = @transform_5, window_bounds = array<i64: 16, 128>}]} {
    %c0_i32 = arith.constant 0 : i32
    %0 = arith.cmpi eq, %arg1, %c0_i32 : i32
    %1 = arith.extui %0 : i1 to i32
    %c0_i32_0 = arith.constant 0 : i32
    %2 = arith.cmpi ne, %1, %c0_i32_0 : i32
    scf.if %2 {
      %cst_18 = arith.constant 0.000000e+00 : f32
      %25 = vector.broadcast %cst_18 : f32 to vector<16x128xf32>
      %c0_19 = arith.constant 0 : index
      %c0_20 = arith.constant 0 : index
      %26 = vector.load %arg8[%c0_19, %c0_20] : memref<16x128xf32, #tpu.memory_space<vmem>>, vector<16x128xf32>
      tpu.vector_store %arg8[%c0_19, %c0_20], %25 {strides = array<i32>} : memref<16x128xf32, #tpu.memory_space<vmem>>, vector<16x128xf32>,
    } else {
    }
    %c0 = arith.constant 0 : index
    %c0_1 = arith.constant 0 : index
    %3 = vector.load %arg2[%c0, %c0_1] : memref<16x128xf32, #tpu.memory_space<vmem>>, vector<16x128xf32>
    %c0_2 = arith.constant 0 : index
    %c0_3 = arith.constant 0 : index
    %4 = vector.load %arg3[%c0_2, %c0_3] : memref<128x256xf32, #tpu.memory_space<vmem>>, vector<128x256xf32>
    %cst = arith.constant dense<0.000000e+00> : vector<16x256xf32>
    %5 = tpu.matmul %3, %4, %cst {dimension_numbers = #tpu.dot_dimension_numbers<[1], [0], [0], [1], [0, 0, 1, 1], [], []>} : vector<16x128xf32>, vector<128x256xf32>, vector<16x256xf32> -> vector<16x256xf32>
    %c0_4 = arith.constant 0 : index
    %c0_5 = arith.constant 0 : index
    %6 = vector.load %arg4[%c0_4, %c0_5] : memref<1x256xf32, #tpu.memory_space<vmem>>, vector<1x256xf32>
    %7 = vector.broadcast %6 : vector<1x256xf32> to vector<16x256xf32>
    %8 = arith.addf %5, %7 : vector<16x256xf32>
    %cst_6 = arith.constant 5.000000e-01 : f32
    %9 = vector.broadcast %cst_6 : f32 to vector<16x256xf32>
    %10 = arith.mulf %9, %8 : vector<16x256xf32>
    %cst_7 = arith.constant 0.707106769 : f32
    %11 = vector.broadcast %cst_7 : f32 to vector<16x256xf32>
    %12 = arith.mulf %8, %11 : vector<16x256xf32>
    %13 = math.erf %12 : vector<16x256xf32>
    %cst_8 = arith.constant 1.000000e+00 : f32
    %14 = vector.broadcast %cst_8 : f32 to vector<16x256xf32>
    %15 = arith.addf %14, %13 : vector<16x256xf32>
    %16 = arith.mulf %10, %15 : vector<16x256xf32>
    %c0_9 = arith.constant 0 : index
    %c0_10 = arith.constant 0 : index
    %17 = vector.load %arg8[%c0_9, %c0_10] : memref<16x128xf32, #tpu.memory_space<vmem>>, vector<16x128xf32>
    %c0_11 = arith.constant 0 : index
    %c0_12 = arith.constant 0 : index
    %18 = vector.load %arg5[%c0_11, %c0_12] : memref<256x128xf32, #tpu.memory_space<vmem>>, vector<256x128xf32>
    %cst_13 = arith.constant dense<0.000000e+00> : vector<16x128xf32>
    %19 = tpu.matmul %16, %18, %cst_13 {dimension_numbers = #tpu.dot_dimension_numbers<[1], [0], [0], [1], [0, 0, 1, 1], [], []>} : vector<16x256xf32>, vector<256x128xf32>, vector<16x128xf32> -> vector<16x128xf32>
    %20 = arith.addf %17, %19 : vector<16x128xf32>
    %c0_14 = arith.constant 0 : index
    %c0_15 = arith.constant 0 : index
    %21 = vector.load %arg8[%c0_14, %c0_15] : memref<16x128xf32, #tpu.memory_space<vmem>>, vector<16x128xf32>
    tpu.vector_store %arg8[%c0_14, %c0_15], %20 {strides = array<i32>} : memref<16x128xf32, #tpu.memory_space<vmem>>, vector<16x128xf32>,
    %c0_i32_16 = arith.constant 0 : i32
    %22 = arith.cmpi eq, %arg1, %c0_i32_16 : i32
    %23 = arith.extui %22 : i1 to i32
    %c0_i32_17 = arith.constant 0 : i32
    %24 = arith.cmpi ne, %23, %c0_i32_17 : i32
    scf.if %24 {
      %c0_18 = arith.constant 0 : index
      %c0_19 = arith.constant 0 : index
      %25 = vector.load %arg8[%c0_18, %c0_19] : memref<16x128xf32, #tpu.memory_space<vmem>>, vector<16x128xf32>
      %c0_20 = arith.constant 0 : index
      %c0_21 = arith.constant 0 : index
      %26 = vector.load %arg6[%c0_20, %c0_21] : memref<1x128xf32, #tpu.memory_space<vmem>>, vector<1x128xf32>
      %27 = vector.broadcast %26 : vector<1x128xf32> to vector<16x128xf32>
      %28 = arith.addf %25, %27 : vector<16x128xf32>
      %c0_22 = arith.constant 0 : index
      %c0_23 = arith.constant 0 : index
      %29 = vector.load %arg7[%c0_22, %c0_23] : memref<16x128xf32, #tpu.memory_space<vmem>>, vector<16x128xf32>
      tpu.vector_store %arg7[%c0_22, %c0_23], %28 {strides = array<i32>} : memref<16x128xf32, #tpu.memory_space<vmem>>, vector<16x128xf32>,
    } else {
    }
    return
  }
  func.func @transform_0(%arg0: i32, %arg1: i32) -> (i32, i32) {
    %c0_i32 = arith.constant 0 : i32
    %c0_i32_0 = arith.constant 0 : i32
    return %arg0, %c0_i32 : i32, i32
  }
  func.func @transform_1(%arg0: i32, %arg1: i32) -> (i32, i32) {
    %c0_i32 = arith.constant 0 : i32
    %c0_i32_0 = arith.constant 0 : i32
    return %c0_i32, %arg1 : i32, i32
  }
  func.func @transform_2(%arg0: i32, %arg1: i32) -> (i32, i32) {
    %c0_i32 = arith.constant 0 : i32
    %c0_i32_0 = arith.constant 0 : i32
    return %c0_i32, %arg1 : i32, i32
  }
  func.func @transform_3(%arg0: i32, %arg1: i32) -> (i32, i32) {
    %c0_i32 = arith.constant 0 : i32
    %c0_i32_0 = arith.constant 0 : i32
    return %arg1, %c0_i32 : i32, i32
  }
  func.func @transform_4(%arg0: i32, %arg1: i32) -> (i32, i32) {
    %c0_i32 = arith.constant 0 : i32
    %c0_i32_0 = arith.constant 0 : i32
    %c0_i32_1 = arith.constant 0 : i32
    return %c0_i32, %c0_i32_0 : i32, i32
  }
  func.func @transform_5(%arg0: i32, %arg1: i32) -> (i32, i32) {
    %c0_i32 = arith.constant 0 : i32
    %c0_i32_0 = arith.constant 0 : i32
    return %arg0, %c0_i32 : i32, i32
  }
}

module attributes {stable_mosaic.version = 11 : i64} {
  func.func @_mlp_kernel(%arg0: i32, %arg1: i32, %arg2: memref<16x128xf32, #tpu.memory_space<vmem>>, %arg3: memref<128x256xf32, #tpu.memory_space<vmem>>, %arg4: memref<1x256xf32, #tpu.memory_space<vmem>>, %arg5: memref<256x128xf32, #tpu.memory_space<vmem>>, %arg6: memref<1x128xf32, #tpu.memory_space<vmem>>, %arg7: memref<16x128xf32, #tpu.memory_space<vmem>>, %arg8: memref<16x128xf32, #tpu.memory_space<vmem>>) attributes {dimension_semantics = [#tpu.dimension_semantics<parallel>, #tpu.dimension_semantics<arbitrary>], iteration_bounds = array<i64: 1, 1>, scalar_prefetch = 0 : i64, scratch_operands = 1 : i64, tpu.core_type = #tpu.core_type<tc>, window_params = [{transform_indices = @transform_0, window_bounds = array<i64: 16, 128>}, {transform_indices = @transform_1, window_bounds = array<i64: 128, 256>}, {transform_indices = @transform_2, window_bounds = array<i64: 1, 256>}, {transform_indices = @transform_3, window_bounds = array<i64: 256, 128>}, {pipeline_mode = #tpu.pipeline_mode<synchronous>, transform_indices = @transform_4, window_bounds = array<i64: 1, 128>}, {transform_indices = @transform_5, window_bounds = array<i64: 16, 128>}]} {
    %c0_i32 = arith.constant 0 : i32
    %0 = arith.cmpi eq, %arg1, %c0_i32 : i32
    %1 = arith.extui %0 : i1 to i32
    %c0_i32_0 = arith.constant 0 : i32
    %2 = arith.cmpi ne, %1, %c0_i32_0 : i32
    scf.if %2 {
      %cst_18 = arith.constant 0.000000e+00 : f32
      %25 = vector.broadcast %cst_18 : f32 to vector<16x128xf32>
      %c0_19 = arith.constant 0 : index
      %c0_20 = arith.constant 0 : index
      %26 = vector.load %arg8[%c0_19, %c0_20] : memref<16x128xf32, #tpu.memory_space<vmem>>, vector<16x128xf32>
      tpu.vector_store %arg8[%c0_19, %c0_20], %25 {strides = array<i32>} : memref<16x128xf32, #tpu.memory_space<vmem>>, vector<16x128xf32>,
    } else {
    }
    %c0 = arith.constant 0 : index
    %c0_1 = arith.constant 0 : index
    %3 = vector.load %arg2[%c0, %c0_1] : memref<16x128xf32, #tpu.memory_space<vmem>>, vector<16x128xf32>
    %c0_2 = arith.constant 0 : index
    %c0_3 = arith.constant 0 : index
    %4 = vector.load %arg3[%c0_2, %c0_3] : memref<128x256xf32, #tpu.memory_space<vmem>>, vector<128x256xf32>
    %cst = arith.constant dense<0.000000e+00> : vector<16x256xf32>
    %5 = tpu.matmul %3, %4, %cst {dimension_numbers = #tpu.dot_dimension_numbers<[1], [0], [0], [1], [0, 0, 1, 1], [], []>} : vector<16x128xf32>, vector<128x256xf32>, vector<16x256xf32> -> vector<16x256xf32>
    %c0_4 = arith.constant 0 : index
    %c0_5 = arith.constant 0 : index
    %6 = vector.load %arg4[%c0_4, %c0_5] : memref<1x256xf32, #tpu.memory_space<vmem>>, vector<1x256xf32>
    %7 = vector.broadcast %6 : vector<1x256xf32> to vector<16x256xf32>
    %8 = arith.addf %5, %7 : vector<16x256xf32>
    %cst_6 = arith.constant 5.000000e-01 : f32
    %9 = vector.broadcast %cst_6 : f32 to vector<16x256xf32>
    %10 = arith.mulf %9, %8 : vector<16x256xf32>
    %cst_7 = arith.constant 0.707106769 : f32
    %11 = vector.broadcast %cst_7 : f32 to vector<16x256xf32>
    %12 = arith.mulf %8, %11 : vector<16x256xf32>
    %13 = math.erf %12 : vector<16x256xf32>
    %cst_8 = arith.constant 1.000000e+00 : f32
    %14 = vector.broadcast %cst_8 : f32 to vector<16x256xf32>
    %15 = arith.addf %14, %13 : vector<16x256xf32>
    %16 = arith.mulf %10, %15 : vector<16x256xf32>
    %c0_9 = arith.constant 0 : index
    %c0_10 = arith.constant 0 : index
    %17 = vector.load %arg8[%c0_9, %c0_10] : memref<16x128xf32, #tpu.memory_space<vmem>>, vector<16x128xf32>
    %c0_11 = arith.constant 0 : index
    %c0_12 = arith.constant 0 : index
    %18 = vector.load %arg5[%c0_11, %c0_12] : memref<256x128xf32, #tpu.memory_space<vmem>>, vector<256x128xf32>
    %cst_13 = arith.constant dense<0.000000e+00> : vector<16x128xf32>
    %19 = tpu.matmul %16, %18, %cst_13 {dimension_numbers = #tpu.dot_dimension_numbers<[1], [0], [0], [1], [0, 0, 1, 1], [], []>} : vector<16x256xf32>, vector<256x128xf32>, vector<16x128xf32> -> vector<16x128xf32>
    %20 = arith.addf %17, %19 : vector<16x128xf32>
    %c0_14 = arith.constant 0 : index
    %c0_15 = arith.constant 0 : index
    %21 = vector.load %arg8[%c0_14, %c0_15] : memref<16x128xf32, #tpu.memory_space<vmem>>, vector<16x128xf32>
    tpu.vector_store %arg8[%c0_14, %c0_15], %20 {strides = array<i32>} : memref<16x128xf32, #tpu.memory_space<vmem>>, vector<16x128xf32>,
    %c0_i32_16 = arith.constant 0 : i32
    %22 = arith.cmpi eq, %arg1, %c0_i32_16 : i32
    %23 = arith.extui %22 : i1 to i32
    %c0_i32_17 = arith.constant 0 : i32
    %24 = arith.cmpi ne, %23, %c0_i32_17 : i32
    scf.if %24 {
      %c0_18 = arith.constant 0 : index
      %c0_19 = arith.constant 0 : index
      %25 = vector.load %arg8[%c0_18, %c0_19] : memref<16x128xf32, #tpu.memory_space<vmem>>, vector<16x128xf32>
      %c0_20 = arith.constant 0 : index
      %c0_21 = arith.constant 0 : index
      %26 = vector.load %arg6[%c0_20, %c0_21] : memref<1x128xf32, #tpu.memory_space<vmem>>, vector<1x128xf32>
      %27 = vector.broadcast %26 : vector<1x128xf32> to vector<16x128xf32>
      %28 = arith.addf %25, %27 : vector<16x128xf32>
      %c0_22 = arith.constant 0 : index
      %c0_23 = arith.constant 0 : index
      %29 = vector.load %arg7[%c0_22, %c0_23] : memref<16x128xf32, #tpu.memory_space<vmem>>, vector<16x128xf32>
      tpu.vector_store %arg7[%c0_22, %c0_23], %28 {strides = array<i32>} : memref<16x128xf32, #tpu.memory_space<vmem>>, vector<16x128xf32>,
    } else {
    }
    return
  }
  func.func @transform_0(%arg0: i32, %arg1: i32) -> (i32, i32) {
    %c0_i32 = arith.constant 0 : i32
    %c0_i32_0 = arith.constant 0 : i32
    return %arg0, %c0_i32 : i32, i32
  }
  func.func @transform_1(%arg0: i32, %arg1: i32) -> (i32, i32) {
    %c0_i32 = arith.constant 0 : i32
    %c0_i32_0 = arith.constant 0 : i32
    return %c0_i32, %arg1 : i32, i32
  }
  func.func @transform_2(%arg0: i32, %arg1: i32) -> (i32, i32) {
    %c0_i32 = arith.constant 0 : i32
    %c0_i32_0 = arith.constant 0 : i32
    return %c0_i32, %arg1 : i32, i32
  }
  func.func @transform_3(%arg0: i32, %arg1: i32) -> (i32, i32) {
    %c0_i32 = arith.constant 0 : i32
    %c0_i32_0 = arith.constant 0 : i32
    return %arg1, %c0_i32 : i32, i32
  }
  func.func @transform_4(%arg0: i32, %arg1: i32) -> (i32, i32) {
    %c0_i32 = arith.constant 0 : i32
    %c0_i32_0 = arith.constant 0 : i32
    %c0_i32_1 = arith.constant 0 : i32
    return %c0_i32, %c0_i32_0 : i32, i32
  }
  func.func @transform_5(%arg0: i32, %arg1: i32) -> (i32, i32) {
    %c0_i32 = arith.constant 0 : i32
    %c0_i32_0 = arith.constant 0 : i32
    return %arg0, %c0_i32 : i32, i32
  }
}

</mosaic_0001>

<bundles_post_ra>
// kernel: tpu_custom_call.1
= control target key start
LH: loop header
LB: loop body
LE: loop exit
PB: predicated region body
PF: predicated region fallthrough
CT: control target
= control target key end

     0   :  { %10 = vsyncpa [#allocation4], 0  ;;  %s676_s0 = inlined_call_operand.hbm [shape: f32[16,128], index: 0, kind: input, shape index: {}]   ;;  %s677_s1 = inlined_call_operand.hbm [shape: f32[128,256], index: 1, kind: input, shape index: {}]   ;;  %s678_s2 = inlined_call_operand.vmem [shape: f32[1,256], index: 2, kind: input, shape index: {}]   ;;  %s679_s3 = inlined_call_operand.hbm [shape: f32[256,128], index: 3, kind: input, shape index: {}]   ;;  %s680_s4 = inlined_call_operand.vmem [shape: f32[1,128], index: 4, kind: input, shape index: {}]   ;;  %s681_s5 = inlined_call_operand.hbm [shape: f32[16,128], index: 5, kind: output, shape index: {}]  }
   0x1   :  { %11 = vsyncpa [#allocation7], 0 }
   0x2   :  { %12 = vsyncpa [#allocation5], 0  ;;  %s572_s18 = smov [#allocation6]   ;;  %s478_s22 = scalar_lea.hbm %s677_s1, 4096 }
   0x3   :  { %s30_s19 = sshll.u32 %s572_s18, 4  ;;  %p479_p0 = scmp.ne.s32.totalorder %s677_s1, %s478_s22  ;;  %s31_s19 = int_to_ptr.vmem [resolvable:$true] %s30_s19 }
   0x4   :  { %p482_p1 = scmp.lt.u32.totalorder %s478_s22, %s677_s1 }
   0x6   :  { %p484_p2 = pnand %p482_p1, %p479_p0 }
   0x8   :  { %487 = shalt.err (!%p484_p2)
}
   0x9   :  { %s488_s27 = scalar_lea.vmem %s31_s19, 4096  ;;  %p493_p4 = scmp.lt.s32.totalorder %s31_s19, %s31_s19 }
   0xa   :  { %p489_p3 = scmp.ne.s32.totalorder %s31_s19, %s488_s27  ;;  %p494_p5 = scmp.lt.s32.totalorder %s488_s27, %s488_s27 }
   0xc   :  { %p495_p6 = por %p494_p5, %p493_p4 }
   0xe   :  { %p496_p7 = pnand %p495_p6, %p489_p3 }
  0x10   :  { %499 = shalt.err (!%p496_p7)
}
  0x11   :  { %s573_s28 = smov 256   ;;  %s574_s29 = smov 16  }
  0x12   :  { %36 = dma.hbm_to_vmem [thread:$0]  %s677_s1, 4096, %s31_s19, [#allocation7], %s573_s28, %s573_s28, %s574_s29  }
  0x13   :  { %s575_s7 = smov [#allocation3]   ;;  %s500_s11 = scalar_lea.hbm %s676_s0, 256 }
  0x14   :  { %s18_s8 = sshll.u32 %s575_s7, 4  ;;  %p501_p8 = scmp.ne.s32.totalorder %s676_s0, %s500_s11  ;;  %s19_s8 = int_to_ptr.vmem [resolvable:$true] %s18_s8 }
  0x15   :  { %p504_p9 = scmp.lt.u32.totalorder %s500_s11, %s676_s0 }
  0x17   :  { %p506_p10 = pnand %p504_p9, %p501_p8 }
  0x19   :  { %509 = shalt.err (!%p506_p10)
}
  0x1a   :  { %s510_s16 = scalar_lea.vmem %s19_s8, 256  ;;  %p515_p12 = scmp.lt.s32.totalorder %s19_s8, %s19_s8 }
  0x1b   :  { %p511_p11 = scmp.ne.s32.totalorder %s19_s8, %s510_s16  ;;  %p516_p13 = scmp.lt.s32.totalorder %s510_s16, %s510_s16 }
  0x1d   :  { %p517_p0 = por %p516_p13, %p515_p12 }
  0x1f   :  { %p518_p1 = pnand %p517_p0, %p511_p11 }
  0x21   :  { %521 = shalt.err (!%p518_p1)
}
  0x22   :  { %s576_s1 = smov 128   ;;  %s577_s17 = smov 8  }
  0x23   :  { %24 = dma.hbm_to_vmem [thread:$0]  %s676_s0, 256, %s19_s8, [#allocation4], %s576_s1, %s576_s1, %s577_s17  }
  0x24   :  { %s578_s20 = smov [#allocation8]   ;;  %s522_s24 = scalar_lea.hbm %s679_s3, 4096 }
  0x25   :  { %s44_s21 = sshll.u32 %s578_s20, 4  ;;  %p523_p2 = scmp.ne.s32.totalorder %s679_s3, %s522_s24  ;;  %s45_s21 = int_to_ptr.vmem [resolvable:$true] %s44_s21 }
  0x26   :  { %p526_p3 = scmp.lt.u32.totalorder %s522_s24, %s679_s3 }
  0x28   :  { %p528_p4 = pnand %p526_p3, %p523_p2 }
  0x2a   :  { %531 = shalt.err (!%p528_p4)
}
  0x2b   :  { %s532_s29 = scalar_lea.vmem %s45_s21, 4096  ;;  %p537_p6 = scmp.lt.s32.totalorder %s45_s21, %s45_s21 }
  0x2c   :  { %p533_p5 = scmp.ne.s32.totalorder %s45_s21, %s532_s29  ;;  %p538_p7 = scmp.lt.s32.totalorder %s532_s29, %s532_s29 }
  0x2e   :  { %p539_p8 = por %p538_p7, %p537_p6 }
  0x30   :  { %p540_p9 = pnand %p539_p8, %p533_p5 }
  0x32   :  { %543 = shalt.err (!%p540_p9)
}
  0x33   :  { %50 = dma.hbm_to_vmem [thread:$0]  %s679_s3, 4096, %s45_s21, [#allocation7], %s576_s1, %s576_s1, %s577_s17  }
  0x34   :  { %566 = dma.done.wait [#allocation4], 256  }
  0x35   :  { %567 = vsyncadd [#allocation4], 4294967040 }
  0x36   :  { %568 = dma.done.wait [#allocation7], 8192  }
  0x37   :  { %569 = vsyncadd [#allocation7], 4294959104  ;;  %v579_v0 = vmov 0.0   ;;  %v71_v1 = vld [vmem:[#allocation6 + $0x8] sm:$0xff]  ;;  %v73_v2 = vld [vmem:[#allocation6 + $0x18] sm:$0xff]  ;;  %s580_s8 = smov [#allocation9]  }
  0x38   :  { %178 = vmatprep.mubr.f32.mxu0 %v579_v0  ;;  %v70_v3 = vld [vmem:[#allocation6] sm:$0xff]  ;;  %v397_v4 = vpack.c.bf16 %v73_v2, %v71_v1  ;;  %v72_v5 = vld [vmem:[#allocation6 + $0x10] sm:$0xff]  ;;  %v75_v6 = vld [vmem:[#allocation6 + $0x28] sm:$0xff]  ;;  %s345_s9 = sshll.u32 %s580_s8, 4  ;;  %s346_s9 = int_to_ptr.vmem [resolvable:$true] %s345_s9 }
  0x39   :  { %v77_v7 = vld [vmem:[#allocation6 + $0x38] sm:$0xff]  ;;  %v399_v8 = vpack.c.bf16 %v72_v5, %v70_v3  ;;  %v74_v10 = vld [vmem:[#allocation6 + $0x20] sm:$0xff]  ;;  %v76_v11 = vld [vmem:[#allocation6 + $0x30] sm:$0xff]  ;;  %s544_s10 = scalar_lea.vmem %s346_s9, 256  ;;  %p549_p11 = scmp.lt.s32.totalorder %s346_s9, %s346_s9 }
  0x3a   :  { %v401_v9 = vpack.c.bf16 %v77_v7, %v75_v6  ;;  %v79_v12 = vld [vmem:[#allocation6 + $0x48] sm:$0xff]  ;;  %398 = vmatprep.subr.bf16.mxu0 %v397_v4  ;;  %v81_v13 = vld [vmem:[#allocation6 + $0x58] sm:$0xff]  ;;  %v403_v14 = vpack.c.bf16 %v76_v11, %v74_v10  ;;  %v78_v16 = vld [vmem:[#allocation6 + $0x40] sm:$0xff]  ;;  %p545_p10 = scmp.ne.s32.totalorder %s346_s9, %s544_s10  ;;  %p550_p12 = scmp.lt.s32.totalorder %s544_s10, %s544_s10 }
  0x3b   :  { %400 = vmatpush1.bf16.msra.mxu0 %v399_v8  ;;  %v405_v15 = vpack.c.bf16 %v81_v13, %v79_v12  ;;  %v80_v17 = vld [vmem:[#allocation6 + $0x50] sm:$0xff]  ;;  %v83_v18 = vld [vmem:[#allocation6 + $0x68] sm:$0xff]  ;;  %v85_v19 = vld [vmem:[#allocation6 + $0x78] sm:$0xff] }
  0x3c   :  { %402 = vmatprep.subr.bf16.mxu0 %v401_v9  ;;  %v407_v20 = vpack.c.bf16 %v80_v17, %v78_v16  ;;  %v409_v21 = vpack.c.bf16 %v85_v19, %v83_v18  ;;  %v82_v22 = vld [vmem:[#allocation6 + $0x60] sm:$0xff]  ;;  %v84_v23 = vld [vmem:[#allocation6 + $0x70] sm:$0xff]  ;;  %v87_v24 = vld [vmem:[#allocation6 + $0x88] sm:$0xff]  ;;  %p551_p13 = por %p550_p12, %p549_p11 }
  0x3d   :  { %v89_v25 = vld [vmem:[#allocation6 + $0x98] sm:$0xff]  ;;  %v86_v26 = vld [vmem:[#allocation6 + $0x80] sm:$0xff]  ;;  %v88_v27 = vld [vmem:[#allocation6 + $0x90] sm:$0xff]  ;;  %v411_v30 = vpack.c.bf16 %v84_v23, %v82_v22 }
  0x3e   :  { %v229_v28 = vld [vmem:[#allocation8 + $0x80] sm:$0xff]  ;;  %v230_v29 = vld [vmem:[#allocation8 + $0x88] sm:$0xff]  ;;  %v231_v35 = vld [vmem:[#allocation8 + $0x90] sm:$0xff]  ;;  %v413_v36 = vpack.c.bf16 %v89_v25, %v87_v24  ;;  %v415_v46 = vpack.c.bf16 %v88_v27, %v86_v26  ;;  %p552_p0 = pnand %p551_p13, %p545_p10 }
  0x3f   :  { %404 = vmatpush1.bf16.msra.mxu0 %v403_v14  ;;  %v91_v31 = vld [vmem:[#allocation6 + $0xa8] sm:$0xff]  ;;  %v429_v32 = vpack.c.bf16 %v230_v29, %v229_v28  ;;  %v213_v33 = vld [vmem:[#allocation8] sm:$0xff]  ;;  %v232_v38 = vld [vmem:[#allocation8 + $0x98] sm:$0xff] }
  0x40   :  { %406 = vmatprep.subr.bf16.mxu0 %v405_v15  ;;  %v214_v34 = vld [vmem:[#allocation8 + $0x8] sm:$0xff]  ;;  %v215_v39 = vld [vmem:[#allocation8 + $0x10] sm:$0xff]  ;;  %v216_v40 = vld [vmem:[#allocation8 + $0x18] sm:$0xff]  ;;  %v433_v42 = vpack.c.bf16 %v232_v38, %v231_v35  ;;  %v104_v35 = vlaneseq }
  0x41   :  { %v431_v37 = vpack.c.bf16 %v214_v34, %v213_v33  ;;  %v93_v41 = vld [vmem:[#allocation6 + $0xb8] sm:$0xff]  ;;  %430 = vmatprep.subr.bf16.mxu1 %v429_v32  ;;  %v233_v43 = vld [vmem:[#allocation8 + $0xa0] sm:$0xff]  ;;  %v234_v44 = vld [vmem:[#allocation8 + $0xa8] sm:$0xff]  ;;  %v435_v45 = vpack.c.bf16 %v216_v40, %v215_v39 }
  0x42   :  { %v437_v47 = vpack.c.bf16 %v234_v44, %v233_v43  ;;  %v217_v48 = vld [vmem:[#allocation8 + $0x20] sm:$0xff]  ;;  %v218_v49 = vld [vmem:[#allocation8 + $0x28] sm:$0xff]  ;;  %v417_v50 = vpack.c.bf16 %v93_v41, %v91_v31  ;;  %v92_v52 = vld [vmem:[#allocation6 + $0xb0] sm:$0xff] }
  0x43   :  { %408 = vmatpush1.bf16.msra.mxu0 %v407_v20  ;;  %432 = vmatpush3.bf16.msra.mxu1 %v431_v37  ;;  %v90_v51 = vld [vmem:[#allocation6 + $0xa0] sm:$0xff]  ;;  %v95_v53 = vld [vmem:[#allocation6 + $0xc8] sm:$0xff]  ;;  %v97_v54 = vld [vmem:[#allocation6 + $0xd8] sm:$0xff]  ;;  %v439_v55 = vpack.c.bf16 %v218_v49, %v217_v48 }
  0x44   :  { %410 = vmatprep.subr.bf16.mxu0 %v409_v21  ;;  %434 = vmatprep.subr.bf16.mxu1 %v433_v42  ;;  %v419_v56 = vpack.c.bf16 %v92_v52, %v90_v51  ;;  %v421_v57 = vpack.c.bf16 %v97_v54, %v95_v53  ;;  %v94_v58 = vld [vmem:[#allocation6 + $0xc0] sm:$0xff]  ;;  %v96_v59 = vld [vmem:[#allocation6 + $0xd0] sm:$0xff]  ;;  %v99_v60 = vld [vmem:[#allocation6 + $0xe8] sm:$0xff] }
  0x45   :  { %v101_v61 = vld [vmem:[#allocation6 + $0xf8] sm:$0xff]  ;;  %v423_v62 = vpack.c.bf16 %v96_v59, %v94_v58  ;;  %v98_v1 = vld [vmem:[#allocation6 + $0xe0] sm:$0xff]  ;;  %v100_v2 = vld [vmem:[#allocation6 + $0xf0] sm:$0xff] }
  0x46   :  { %v425_v63 = vpack.c.bf16 %v101_v61, %v99_v60  ;;  %v427_v3 = vpack.c.bf16 %v100_v2, %v98_v1  ;;  %v68_v4 = vld [vmem:[#allocation3] sm:$0xff]  ;;  %v69_v5 = vld [vmem:[#allocation3 + $0x8] sm:$0xff]  ;;  %v237_v12 = vld [vmem:[#allocation8 + $0xc0] sm:$0xff] }
  0x47   :  { %412 = vmatpush1.bf16.msra.mxu0 %v411_v30  ;;  %436 = vmatpush3.bf16.msra.mxu1 %v435_v45  ;;  %v235_v6 = vld [vmem:[#allocation8 + $0xb0] sm:$0xff]  ;;  %v236_v7 = vld [vmem:[#allocation8 + $0xb8] sm:$0xff]  ;;  %v238_v13 = vld [vmem:[#allocation8 + $0xc8] sm:$0xff] }
  0x48   :  { %414 = vmatprep.subr.bf16.mxu0 %v413_v36  ;;  %438 = vmatprep.subr.bf16.mxu1 %v437_v47  ;;  %v441_v8 = vpack.c.bf16 %v236_v7, %v235_v6  ;;  %v219_v9 = vld [vmem:[#allocation8 + $0x30] sm:$0xff]  ;;  %v220_v10 = vld [vmem:[#allocation8 + $0x38] sm:$0xff]  ;;  %v445_v14 = vpack.c.bf16 %v238_v13, %v237_v12  ;;  %v221_v15 = vld [vmem:[#allocation8 + $0x40] sm:$0xff]  ;;  %v105_v36 = vshrl.u32 %v104_v35, 7 }
  0x49   :  { %v443_v11 = vpack.c.bf16 %v220_v10, %v219_v9  ;;  %v222_v16 = vld [vmem:[#allocation8 + $0x48] sm:$0xff]  ;;  %v239_v18 = vld [vmem:[#allocation8 + $0xd0] sm:$0xff]  ;;  %v224_v21 = vld [vmem:[#allocation8 + $0x58] sm:$0xff] }
  0x4a   :  { %v447_v17 = vpack.c.bf16 %v222_v16, %v221_v15  ;;  %v223_v20 = vld [vmem:[#allocation8 + $0x50] sm:$0xff]  ;;  %v241_v23 = vld [vmem:[#allocation8 + $0xe0] sm:$0xff]  ;;  %v242_v24 = vld [vmem:[#allocation8 + $0xe8] sm:$0xff]  ;;  %v106_v37 = vsub.s32 0, %v105_v36  ;;  %v110_v39 = vsub.s32 1, %v105_v36 }
  0x4b   :  { %416 = vmatpush1.bf16.msra.mxu0 %v415_v46  ;;  %440 = vmatpush3.bf16.msra.mxu1 %v439_v55  ;;  %v451_v22 = vpack.c.bf16 %v224_v21, %v223_v20  ;;  %v453_v25 = vpack.c.bf16 %v242_v24, %v241_v23  ;;  %v225_v26 = vld [vmem:[#allocation8 + $0x60] sm:$0xff]  ;;  %v226_v27 = vld [vmem:[#allocation8 + $0x68] sm:$0xff]  ;;  %v243_v29 = vld [vmem:[#allocation8 + $0xf0] sm:$0xff] }
  0x4c   :  { %418 = vmatprep.subr.bf16.mxu0 %v417_v50  ;;  %442 = vmatprep.subr.bf16.mxu1 %v441_v8  ;;  %v455_v28 = vpack.c.bf16 %v226_v27, %v225_v26  ;;  %v244_v30 = vld [vmem:[#allocation8 + $0xf8] sm:$0xff]  ;;  %v227_v32 = vld [vmem:[#allocation8 + $0x70] sm:$0xff] }
  0x4d   :  { %v457_v31 = vpack.c.bf16 %v244_v30, %v243_v29  ;;  %v228_v33 = vld [vmem:[#allocation8 + $0x78] sm:$0xff]  ;;  %v102_v38 = vld [vmem:[%s678_s2] sm:$0x3] }
  0x4e   :  { %v459_v34 = vpack.c.bf16 %v228_v33, %v227_v32  ;;  %v107_v40 = vrot.slane %v102_v38, %v106_v37  ;;  %v111_v41 = vrot.slane %v102_v38, %v110_v39  ;;  %v358_v9 = vld [vmem:[%s680_s4] ss:$0 sm:$0xff] }
  0x4f   :  { %420 = vmatpush1.bf16.msra.mxu0 %v419_v56  ;;  %444 = vmatpush3.bf16.msra.mxu1 %v443_v11 }
  0x50   :  { %422 = vmatprep.subr.bf16.mxu0 %v421_v57  ;;  %446 = vmatprep.subr.bf16.mxu1 %v445_v14 }
  0x53   :  { %424 = vmatpush1.bf16.msra.mxu0 %v423_v62  ;;  %448 = vmatpush3.bf16.msra.mxu1 %v447_v17 }
  0x54   :  { %426 = vmatprep.subr.bf16.mxu0 %v425_v63 }
  0x57   :  { %428 = vmatpush1.bf16.msra.mxu0 %v427_v3 }
  0x5a   :  { %179 = vmatmul.mubr.f32.vlgmr.msra.gmra.mrb[0].mxu0 %v68_v4 }
  0x5b   :  { %184 = vmatprep.mubr.f32.mxu0 %v579_v0  ;;  %v240_v0 = vld [vmem:[#allocation8 + $0xd8] sm:$0xff] }
  0x5c   :  { %v449_v19 = vpack.c.bf16 %v240_v0, %v239_v18 }
  0x5e   :  { %185 = vmatmul.mubr.f32.gmra.mrb[2].mxu0 %v69_v5  ;;  %450 = vmatprep.subr.bf16.mxu1 %v449_v19 }
  0x5f   :  { %452 = vmatpush3.bf16.msra.mxu1 %v451_v22 }
  0x60   :  { %454 = vmatprep.subr.bf16.mxu1 %v453_v25 }
  0x63   :  { %456 = vmatpush3.bf16.msra.mxu1 %v455_v28 }
  0x64   :  { %458 = vmatprep.subr.bf16.mxu1 %v457_v31 }
  0x67   :  { %460 = vmatpush3.bf16.msra.mxu1 %v459_v34 }
 0x12d   :  { %v180_v42 = vpop.f32.mrb[0].mxu0 }
 0x12e   :  { %v181_v43 = vadd.f32 %v180_v42, %v107_v40  ;;  %v182_v44 = vpop.f32.mrb[1].mxu0 }
 0x12f   :  { %v183_v45 = vadd.f32 %v182_v44, %v111_v41 }
 0x130   :  { %v195_v46 = vmul.f32 0.70710677, %v181_v43  ;;  %v191_v59 = vmul.f32 0.5, %v181_v43 }
 0x131   :  { %v196_v47 = vmul.f32 0.70710677, %v183_v45  ;;  %v186_v48 = vpop.f32.mrb[2].mxu0  ;;  %v192_v57 = vmul.f32 0.5, %v183_v45 }
 0x132   :  { %470 = verf.f32 %v195_v46  ;;  %v187_v49 = vadd.f32 %v186_v48, %v107_v40  ;;  %v188_v50 = vpop.f32.mrb[3].mxu0 }
 0x133   :  { %472 = verf.f32 %v196_v47  ;;  %v189_v51 = vadd.f32 %v188_v50, %v111_v41 }
 0x134   :  { %v197_v52 = vmul.f32 0.70710677, %v187_v49  ;;  %v193_v4 = vmul.f32 0.5, %v187_v49 }
 0x135   :  { %v198_v53 = vmul.f32 0.70710677, %v189_v51  ;;  %v194_v2 = vmul.f32 0.5, %v189_v51 }
 0x136   :  { %474 = verf.f32 %v197_v52 }
 0x137   :  { %476 = verf.f32 %v198_v53 }
 0x13c   :  { %v471_v54 = vpop.eup %470 }
 0x13d   :  { %v473_v55 = vpop.eup %472  ;;  %v203_v56 = vadd.f32 1.0, %v471_v54 }
 0x13e   :  { %v204_v58 = vadd.f32 1.0, %v473_v55 }
 0x13f   :  { %v207_v1 = vmul.f32 %v203_v56, %v191_v59 }
 0x140   :  { %v475_v60 = vpop.eup %474  ;;  %v208_v61 = vmul.f32 %v204_v58, %v192_v57 }
 0x141   :  { %v477_v62 = vpop.eup %476  ;;  %v205_v63 = vadd.f32 1.0, %v475_v60 }
 0x142   :  { %v206_v3 = vadd.f32 1.0, %v477_v62  ;;  %309 = vmatprep.mubr.f32.mxu1 %v208_v61 }
 0x143   :  { %310 = vmatmul.mubr.f32.vlgmr.msra.gmra.mrb[0].mxu1 %v207_v1  ;;  %v209_v6 = vmul.f32 %v205_v63, %v193_v4 }
 0x144   :  { %v210_v5 = vmul.f32 %v206_v3, %v194_v2 }
 0x146   :  { %314 = vmatprep.mubr.f32.mxu1 %v210_v5 }
 0x147   :  { %315 = vmatmul.mubr.f32.gmra.mrb[2].mxu1 %v209_v6 }
 0x216   :  { %v391_v7 = vpop.f32.mrb[0].mxu1 }
 0x217   :  { %v392_v8 = vpop.f32.mrb[1].mxu1 }
 0x218   :  { %v393_v10 = vadd.f32 %v392_v8, %v391_v7 }
 0x21a   :  { %v336_v11 = vadd.f32 %v393_v10, %v358_v9  ;;  %v394_v12 = vpop.f32.mrb[2].mxu1 }
 0x21b   :  { %v395_v13 = vpop.f32.mrb[3].mxu1 }
 0x21c   :  { %338 = vst [vmem:[#allocation9] sm:$0xff] %v336_v11  ;;  %v396_v14 = vadd.f32 %v395_v13, %v394_v12 }
 0x21e   :  { %v337_v15 = vadd.f32 %v396_v14, %v358_v9 }
 0x220   :  { %339 = vst [vmem:[#allocation9 + $0x8] sm:$0xff] %v337_v15 }
 0x221   :  { %555 = shalt.err (!%p552_p0)
}
 0x222   :  { %s556_s12 = scalar_lea.hbm %s681_s5, 256 }
 0x223   :  { %p557_p1 = scmp.ne.s32.totalorder %s681_s5, %s556_s12  ;;  %p560_p2 = scmp.lt.u32.totalorder %s556_s12, %s681_s5 }
 0x225   :  { %p562_p3 = pnand %p560_p2, %p557_p1 }
 0x227   :  { %565 = shalt.err (!%p562_p3)
}
 0x228   :  { %351 = dma.vmem_to_hbm [thread:$0]  %s346_s9, 256, %s681_s5, [#allocation5], %s576_s1, %s576_s1, %s577_s17  }
 0x229   :  { %570 = dma.done.wait [#allocation5], 256  }
 0x22a   :  { %571 = vsyncadd [#allocation5], 4294967040 }
 0x22b   :  { %355 = vsyncpa [#allocation4], 1 }
 0x22c   :  { %356 = vsyncpa [#allocation7], 1 }
 0x22d   :  { %357 = vsyncpa [#allocation5], 1 }

// kernel: tpu_custom_call.1
= control target key start
LH: loop header
LB: loop body
LE: loop exit
PB: predicated region body
PF: predicated region fallthrough
CT: control target
= control target key end

     0   :  { %10 = vsyncpa [#allocation4], 0  ;;  %s676_s0 = inlined_call_operand.hbm [shape: f32[16,128], index: 0, kind: input, shape index: {}]   ;;  %s677_s1 = inlined_call_operand.hbm [shape: f32[128,256], index: 1, kind: input, shape index: {}]   ;;  %s678_s2 = inlined_call_operand.vmem [shape: f32[1,256], index: 2, kind: input, shape index: {}]   ;;  %s679_s3 = inlined_call_operand.hbm [shape: f32[256,128], index: 3, kind: input, shape index: {}]   ;;  %s680_s4 = inlined_call_operand.vmem [shape: f32[1,128], index: 4, kind: input, shape index: {}]   ;;  %s681_s5 = inlined_call_operand.hbm [shape: f32[16,128], index: 5, kind: output, shape index: {}]  }
   0x1   :  { %11 = vsyncpa [#allocation7], 0 }
   0x2   :  { %12 = vsyncpa [#allocation5], 0  ;;  %s572_s18 = smov [#allocation6]   ;;  %s478_s22 = scalar_lea.hbm %s677_s1, 4096 }
   0x3   :  { %s30_s19 = sshll.u32 %s572_s18, 4  ;;  %p479_p0 = scmp.ne.s32.totalorder %s677_s1, %s478_s22  ;;  %s31_s19 = int_to_ptr.vmem [resolvable:$true] %s30_s19 }
   0x4   :  { %p482_p1 = scmp.lt.u32.totalorder %s478_s22, %s677_s1 }
   0x6   :  { %p484_p2 = pnand %p482_p1, %p479_p0 }
   0x8   :  { %487 = shalt.err (!%p484_p2)
}
   0x9   :  { %s488_s27 = scalar_lea.vmem %s31_s19, 4096  ;;  %p493_p4 = scmp.lt.s32.totalorder %s31_s19, %s31_s19 }
   0xa   :  { %p489_p3 = scmp.ne.s32.totalorder %s31_s19, %s488_s27  ;;  %p494_p5 = scmp.lt.s32.totalorder %s488_s27, %s488_s27 }
   0xc   :  { %p495_p6 = por %p494_p5, %p493_p4 }
   0xe   :  { %p496_p7 = pnand %p495_p6, %p489_p3 }
  0x10   :  { %499 = shalt.err (!%p496_p7)
}
  0x11   :  { %s573_s28 = smov 256   ;;  %s574_s29 = smov 16  }
  0x12   :  { %36 = dma.hbm_to_vmem [thread:$0]  %s677_s1, 4096, %s31_s19, [#allocation7], %s573_s28, %s573_s28, %s574_s29  }
  0x13   :  { %s575_s7 = smov [#allocation3]   ;;  %s500_s11 = scalar_lea.hbm %s676_s0, 256 }
  0x14   :  { %s18_s8 = sshll.u32 %s575_s7, 4  ;;  %p501_p8 = scmp.ne.s32.totalorder %s676_s0, %s500_s11  ;;  %s19_s8 = int_to_ptr.vmem [resolvable:$true] %s18_s8 }
  0x15   :  { %p504_p9 = scmp.lt.u32.totalorder %s500_s11, %s676_s0 }
  0x17   :  { %p506_p10 = pnand %p504_p9, %p501_p8 }
  0x19   :  { %509 = shalt.err (!%p506_p10)
}
  0x1a   :  { %s510_s16 = scalar_lea.vmem %s19_s8, 256  ;;  %p515_p12 = scmp.lt.s32.totalorder %s19_s8, %s19_s8 }
  0x1b   :  { %p511_p11 = scmp.ne.s32.totalorder %s19_s8, %s510_s16  ;;  %p516_p13 = scmp.lt.s32.totalorder %s510_s16, %s510_s16 }
  0x1d   :  { %p517_p0 = por %p516_p13, %p515_p12 }
  0x1f   :  { %p518_p1 = pnand %p517_p0, %p511_p11 }
  0x21   :  { %521 = shalt.err (!%p518_p1)
}
  0x22   :  { %s576_s1 = smov 128   ;;  %s577_s17 = smov 8  }
  0x23   :  { %24 = dma.hbm_to_vmem [thread:$0]  %s676_s0, 256, %s19_s8, [#allocation4], %s576_s1, %s576_s1, %s577_s17  }
  0x24   :  { %s578_s20 = smov [#allocation8]   ;;  %s522_s24 = scalar_lea.hbm %s679_s3, 4096 }
  0x25   :  { %s44_s21 = sshll.u32 %s578_s20, 4  ;;  %p523_p2 = scmp.ne.s32.totalorder %s679_s3, %s522_s24  ;;  %s45_s21 = int_to_ptr.vmem [resolvable:$true] %s44_s21 }
  0x26   :  { %p526_p3 = scmp.lt.u32.totalorder %s522_s24, %s679_s3 }
  0x28   :  { %p528_p4 = pnand %p526_p3, %p523_p2 }
  0x2a   :  { %531 = shalt.err (!%p528_p4)
}
  0x2b   :  { %s532_s29 = scalar_lea.vmem %s45_s21, 4096  ;;  %p537_p6 = scmp.lt.s32.totalorder %s45_s21, %s45_s21 }
  0x2c   :  { %p533_p5 = scmp.ne.s32.totalorder %s45_s21, %s532_s29  ;;  %p538_p7 = scmp.lt.s32.totalorder %s532_s29, %s532_s29 }
  0x2e   :  { %p539_p8 = por %p538_p7, %p537_p6 }
  0x30   :  { %p540_p9 = pnand %p539_p8, %p533_p5 }
  0x32   :  { %543 = shalt.err (!%p540_p9)
}
  0x33   :  { %50 = dma.hbm_to_vmem [thread:$0]  %s679_s3, 4096, %s45_s21, [#allocation7], %s576_s1, %s576_s1, %s577_s17  }
  0x34   :  { %566 = dma.done.wait [#allocation4], 256  }
  0x35   :  { %567 = vsyncadd [#allocation4], 4294967040 }
  0x36   :  { %568 = dma.done.wait [#allocation7], 8192  }
  0x37   :  { %569 = vsyncadd [#allocation7], 4294959104  ;;  %v579_v0 = vmov 0.0   ;;  %v71_v1 = vld [vmem:[#allocation6 + $0x8] sm:$0xff]  ;;  %v73_v2 = vld [vmem:[#allocation6 + $0x18] sm:$0xff]  ;;  %s580_s8 = smov [#allocation9]  }
  0x38   :  { %178 = vmatprep.mubr.f32.mxu0 %v579_v0  ;;  %v70_v3 = vld [vmem:[#allocation6] sm:$0xff]  ;;  %v397_v4 = vpack.c.bf16 %v73_v2, %v71_v1  ;;  %v72_v5 = vld [vmem:[#allocation6 + $0x10] sm:$0xff]  ;;  %v75_v6 = vld [vmem:[#allocation6 + $0x28] sm:$0xff]  ;;  %s345_s9 = sshll.u32 %s580_s8, 4  ;;  %s346_s9 = int_to_ptr.vmem [resolvable:$true] %s345_s9 }
  0x39   :  { %v77_v7 = vld [vmem:[#allocation6 + $0x38] sm:$0xff]  ;;  %v399_v8 = vpack.c.bf16 %v72_v5, %v70_v3  ;;  %v74_v10 = vld [vmem:[#allocation6 + $0x20] sm:$0xff]  ;;  %v76_v11 = vld [vmem:[#allocation6 + $0x30] sm:$0xff]  ;;  %s544_s10 = scalar_lea.vmem %s346_s9, 256  ;;  %p549_p11 = scmp.lt.s32.totalorder %s346_s9, %s346_s9 }
  0x3a   :  { %v401_v9 = vpack.c.bf16 %v77_v7, %v75_v6  ;;  %v79_v12 = vld [vmem:[#allocation6 + $0x48] sm:$0xff]  ;;  %398 = vmatprep.subr.bf16.mxu0 %v397_v4  ;;  %v81_v13 = vld [vmem:[#allocation6 + $0x58] sm:$0xff]  ;;  %v403_v14 = vpack.c.bf16 %v76_v11, %v74_v10  ;;  %v78_v16 = vld [vmem:[#allocation6 + $0x40] sm:$0xff]  ;;  %p545_p10 = scmp.ne.s32.totalorder %s346_s9, %s544_s10  ;;  %p550_p12 = scmp.lt.s32.totalorder %s544_s10, %s544_s10 }
  0x3b   :  { %400 = vmatpush1.bf16.msra.mxu0 %v399_v8  ;;  %v405_v15 = vpack.c.bf16 %v81_v13, %v79_v12  ;;  %v80_v17 = vld [vmem:[#allocation6 + $0x50] sm:$0xff]  ;;  %v83_v18 = vld [vmem:[#allocation6 + $0x68] sm:$0xff]  ;;  %v85_v19 = vld [vmem:[#allocation6 + $0x78] sm:$0xff] }
  0x3c   :  { %402 = vmatprep.subr.bf16.mxu0 %v401_v9  ;;  %v407_v20 = vpack.c.bf16 %v80_v17, %v78_v16  ;;  %v409_v21 = vpack.c.bf16 %v85_v19, %v83_v18  ;;  %v82_v22 = vld [vmem:[#allocation6 + $0x60] sm:$0xff]  ;;  %v84_v23 = vld [vmem:[#allocation6 + $0x70] sm:$0xff]  ;;  %v87_v24 = vld [vmem:[#allocation6 + $0x88] sm:$0xff]  ;;  %p551_p13 = por %p550_p12, %p549_p11 }
  0x3d   :  { %v89_v25 = vld [vmem:[#allocation6 + $0x98] sm:$0xff]  ;;  %v86_v26 = vld [vmem:[#allocation6 + $0x80] sm:$0xff]  ;;  %v88_v27 = vld [vmem:[#allocation6 + $0x90] sm:$0xff]  ;;  %v411_v30 = vpack.c.bf16 %v84_v23, %v82_v22 }
  0x3e   :  { %v229_v28 = vld [vmem:[#allocation8 + $0x80] sm:$0xff]  ;;  %v230_v29 = vld [vmem:[#allocation8 + $0x88] sm:$0xff]  ;;  %v231_v35 = vld [vmem:[#allocation8 + $0x90] sm:$0xff]  ;;  %v413_v36 = vpack.c.bf16 %v89_v25, %v87_v24  ;;  %v415_v46 = vpack.c.bf16 %v88_v27, %v86_v26  ;;  %p552_p0 = pnand %p551_p13, %p545_p10 }
  0x3f   :  { %404 = vmatpush1.bf16.msra.mxu0 %v403_v14  ;;  %v91_v31 = vld [vmem:[#allocation6 + $0xa8] sm:$0xff]  ;;  %v429_v32 = vpack.c.bf16 %v230_v29, %v229_v28  ;;  %v213_v33 = vld [vmem:[#allocation8] sm:$0xff]  ;;  %v232_v38 = vld [vmem:[#allocation8 + $0x98] sm:$0xff] }
  0x40   :  { %406 = vmatprep.subr.bf16.mxu0 %v405_v15  ;;  %v214_v34 = vld [vmem:[#allocation8 + $0x8] sm:$0xff]  ;;  %v215_v39 = vld [vmem:[#allocation8 + $0x10] sm:$0xff]  ;;  %v216_v40 = vld [vmem:[#allocation8 + $0x18] sm:$0xff]  ;;  %v433_v42 = vpack.c.bf16 %v232_v38, %v231_v35  ;;  %v104_v35 = vlaneseq }
  0x41   :  { %v431_v37 = vpack.c.bf16 %v214_v34, %v213_v33  ;;  %v93_v41 = vld [vmem:[#allocation6 + $0xb8] sm:$0xff]  ;;  %430 = vmatprep.subr.bf16.mxu1 %v429_v32  ;;  %v233_v43 = vld [vmem:[#allocation8 + $0xa0] sm:$0xff]  ;;  %v234_v44 = vld [vmem:[#allocation8 + $0xa8] sm:$0xff]  ;;  %v435_v45 = vpack.c.bf16 %v216_v40, %v215_v39 }
  0x42   :  { %v437_v47 = vpack.c.bf16 %v234_v44, %v233_v43  ;;  %v217_v48 = vld [vmem:[#allocation8 + $0x20] sm:$0xff]  ;;  %v218_v49 = vld [vmem:[#allocation8 + $0x28] sm:$0xff]  ;;  %v417_v50 = vpack.c.bf16 %v93_v41, %v91_v31  ;;  %v92_v52 = vld [vmem:[#allocation6 + $0xb0] sm:$0xff] }
  0x43   :  { %408 = vmatpush1.bf16.msra.mxu0 %v407_v20  ;;  %432 = vmatpush3.bf16.msra.mxu1 %v431_v37  ;;  %v90_v51 = vld [vmem:[#allocation6 + $0xa0] sm:$0xff]  ;;  %v95_v53 = vld [vmem:[#allocation6 + $0xc8] sm:$0xff]  ;;  %v97_v54 = vld [vmem:[#allocation6 + $0xd8] sm:$0xff]  ;;  %v439_v55 = vpack.c.bf16 %v218_v49, %v217_v48 }
  0x44   :  { %410 = vmatprep.subr.bf16.mxu0 %v409_v21  ;;  %434 = vmatprep.subr.bf16.mxu1 %v433_v42  ;;  %v419_v56 = vpack.c.bf16 %v92_v52, %v90_v51  ;;  %v421_v57 = vpack.c.bf16 %v97_v54, %v95_v53  ;;  %v94_v58 = vld [vmem:[#allocation6 + $0xc0] sm:$0xff]  ;;  %v96_v59 = vld [vmem:[#allocation6 + $0xd0] sm:$0xff]  ;;  %v99_v60 = vld [vmem:[#allocation6 + $0xe8] sm:$0xff] }
  0x45   :  { %v101_v61 = vld [vmem:[#allocation6 + $0xf8] sm:$0xff]  ;;  %v423_v62 = vpack.c.bf16 %v96_v59, %v94_v58  ;;  %v98_v1 = vld [vmem:[#allocation6 + $0xe0] sm:$0xff]  ;;  %v100_v2 = vld [vmem:[#allocation6 + $0xf0] sm:$0xff] }
  0x46   :  { %v425_v63 = vpack.c.bf16 %v101_v61, %v99_v60  ;;  %v427_v3 = vpack.c.bf16 %v100_v2, %v98_v1  ;;  %v68_v4 = vld [vmem:[#allocation3] sm:$0xff]  ;;  %v69_v5 = vld [vmem:[#allocation3 + $0x8] sm:$0xff]  ;;  %v237_v12 = vld [vmem:[#allocation8 + $0xc0] sm:$0xff] }
  0x47   :  { %412 = vmatpush1.bf16.msra.mxu0 %v411_v30  ;;  %436 = vmatpush3.bf16.msra.mxu1 %v435_v45  ;;  %v235_v6 = vld [vmem:[#allocation8 + $0xb0] sm:$0xff]  ;;  %v236_v7 = vld [vmem:[#allocation8 + $0xb8] sm:$0xff]  ;;  %v238_v13 = vld [vmem:[#allocation8 + $0xc8] sm:$0xff] }
  0x48   :  { %414 = vmatprep.subr.bf16.mxu0 %v413_v36  ;;  %438 = vmatprep.subr.bf16.mxu1 %v437_v47  ;;  %v441_v8 = vpack.c.bf16 %v236_v7, %v235_v6  ;;  %v219_v9 = vld [vmem:[#allocation8 + $0x30] sm:$0xff]  ;;  %v220_v10 = vld [vmem:[#allocation8 + $0x38] sm:$0xff]  ;;  %v445_v14 = vpack.c.bf16 %v238_v13, %v237_v12  ;;  %v221_v15 = vld [vmem:[#allocation8 + $0x40] sm:$0xff]  ;;  %v105_v36 = vshrl.u32 %v104_v35, 7 }
  0x49   :  { %v443_v11 = vpack.c.bf16 %v220_v10, %v219_v9  ;;  %v222_v16 = vld [vmem:[#allocation8 + $0x48] sm:$0xff]  ;;  %v239_v18 = vld [vmem:[#allocation8 + $0xd0] sm:$0xff]  ;;  %v224_v21 = vld [vmem:[#allocation8 + $0x58] sm:$0xff] }
  0x4a   :  { %v447_v17 = vpack.c.bf16 %v222_v16, %v221_v15  ;;  %v223_v20 = vld [vmem:[#allocation8 + $0x50] sm:$0xff]  ;;  %v241_v23 = vld [vmem:[#allocation8 + $0xe0] sm:$0xff]  ;;  %v242_v24 = vld [vmem:[#allocation8 + $0xe8] sm:$0xff]  ;;  %v106_v37 = vsub.s32 0, %v105_v36  ;;  %v110_v39 = vsub.s32 1, %v105_v36 }
  0x4b   :  { %416 = vmatpush1.bf16.msra.mxu0 %v415_v46  ;;  %440 = vmatpush3.bf16.msra.mxu1 %v439_v55  ;;  %v451_v22 = vpack.c.bf16 %v224_v21, %v223_v20  ;;  %v453_v25 = vpack.c.bf16 %v242_v24, %v241_v23  ;;  %v225_v26 = vld [vmem:[#allocation8 + $0x60] sm:$0xff]  ;;  %v226_v27 = vld [vmem:[#allocation8 + $0x68] sm:$0xff]  ;;  %v243_v29 = vld [vmem:[#allocation8 + $0xf0] sm:$0xff] }
  0x4c   :  { %418 = vmatprep.subr.bf16.mxu0 %v417_v50  ;;  %442 = vmatprep.subr.bf16.mxu1 %v441_v8  ;;  %v455_v28 = vpack.c.bf16 %v226_v27, %v225_v26  ;;  %v244_v30 = vld [vmem:[#allocation8 + $0xf8] sm:$0xff]  ;;  %v227_v32 = vld [vmem:[#allocation8 + $0x70] sm:$0xff] }
  0x4d   :  { %v457_v31 = vpack.c.bf16 %v244_v30, %v243_v29  ;;  %v228_v33 = vld [vmem:[#allocation8 + $0x78] sm:$0xff]  ;;  %v102_v38 = vld [vmem:[%s678_s2] sm:$0x3] }
  0x4e   :  { %v459_v34 = vpack.c.bf16 %v228_v33, %v227_v32  ;;  %v107_v40 = vrot.slane %v102_v38, %v106_v37  ;;  %v111_v41 = vrot.slane %v102_v38, %v110_v39  ;;  %v358_v9 = vld [vmem:[%s680_s4] ss:$0 sm:$0xff] }
  0x4f   :  { %420 = vmatpush1.bf16.msra.mxu0 %v419_v56  ;;  %444 = vmatpush3.bf16.msra.mxu1 %v443_v11 }
  0x50   :  { %422 = vmatprep.subr.bf16.mxu0 %v421_v57  ;;  %446 = vmatprep.subr.bf16.mxu1 %v445_v14 }
  0x53   :  { %424 = vmatpush1.bf16.msra.mxu0 %v423_v62  ;;  %448 = vmatpush3.bf16.msra.mxu1 %v447_v17 }
  0x54   :  { %426 = vmatprep.subr.bf16.mxu0 %v425_v63 }
  0x57   :  { %428 = vmatpush1.bf16.msra.mxu0 %v427_v3 }
  0x5a   :  { %179 = vmatmul.mubr.f32.vlgmr.msra.gmra.mrb[0].mxu0 %v68_v4 }
  0x5b   :  { %184 = vmatprep.mubr.f32.mxu0 %v579_v0  ;;  %v240_v0 = vld [vmem:[#allocation8 + $0xd8] sm:$0xff] }
  0x5c   :  { %v449_v19 = vpack.c.bf16 %v240_v0, %v239_v18 }
  0x5e   :  { %185 = vmatmul.mubr.f32.gmra.mrb[2].mxu0 %v69_v5  ;;  %450 = vmatprep.subr.bf16.mxu1 %v449_v19 }
  0x5f   :  { %452 = vmatpush3.bf16.msra.mxu1 %v451_v22 }
  0x60   :  { %454 = vmatprep.subr.bf16.mxu1 %v453_v25 }
  0x63   :  { %456 = vmatpush3.bf16.msra.mxu1 %v455_v28 }
  0x64   :  { %458 = vmatprep.subr.bf16.mxu1 %v457_v31 }
  0x67   :  { %460 = vmatpush3.bf16.msra.mxu1 %v459_v34 }
 0x12d   :  { %v180_v42 = vpop.f32.mrb[0].mxu0 }
 0x12e   :  { %v181_v43 = vadd.f32 %v180_v42, %v107_v40  ;;  %v182_v44 = vpop.f32.mrb[1].mxu0 }
 0x12f   :  { %v183_v45 = vadd.f32 %v182_v44, %v111_v41 }
 0x130   :  { %v195_v46 = vmul.f32 0.70710677, %v181_v43  ;;  %v191_v59 = vmul.f32 0.5, %v181_v43 }
 0x131   :  { %v196_v47 = vmul.f32 0.70710677, %v183_v45  ;;  %v186_v48 = vpop.f32.mrb[2].mxu0  ;;  %v192_v57 = vmul.f32 0.5, %v183_v45 }
 0x132   :  { %470 = verf.f32 %v195_v46  ;;  %v187_v49 = vadd.f32 %v186_v48, %v107_v40  ;;  %v188_v50 = vpop.f32.mrb[3].mxu0 }
 0x133   :  { %472 = verf.f32 %v196_v47  ;;  %v189_v51 = vadd.f32 %v188_v50, %v111_v41 }
 0x134   :  { %v197_v52 = vmul.f32 0.70710677, %v187_v49  ;;  %v193_v4 = vmul.f32 0.5, %v187_v49 }
 0x135   :  { %v198_v53 = vmul.f32 0.70710677, %v189_v51  ;;  %v194_v2 = vmul.f32 0.5, %v189_v51 }
 0x136   :  { %474 = verf.f32 %v197_v52 }
 0x137   :  { %476 = verf.f32 %v198_v53 }
 0x13c   :  { %v471_v54 = vpop.eup %470 }
 0x13d   :  { %v473_v55 = vpop.eup %472  ;;  %v203_v56 = vadd.f32 1.0, %v471_v54 }
 0x13e   :  { %v204_v58 = vadd.f32 1.0, %v473_v55 }
 0x13f   :  { %v207_v1 = vmul.f32 %v203_v56, %v191_v59 }
 0x140   :  { %v475_v60 = vpop.eup %474  ;;  %v208_v61 = vmul.f32 %v204_v58, %v192_v57 }
 0x141   :  { %v477_v62 = vpop.eup %476  ;;  %v205_v63 = vadd.f32 1.0, %v475_v60 }
 0x142   :  { %v206_v3 = vadd.f32 1.0, %v477_v62  ;;  %309 = vmatprep.mubr.f32.mxu1 %v208_v61 }
 0x143   :  { %310 = vmatmul.mubr.f32.vlgmr.msra.gmra.mrb[0].mxu1 %v207_v1  ;;  %v209_v6 = vmul.f32 %v205_v63, %v193_v4 }
 0x144   :  { %v210_v5 = vmul.f32 %v206_v3, %v194_v2 }
 0x146   :  { %314 = vmatprep.mubr.f32.mxu1 %v210_v5 }
 0x147   :  { %315 = vmatmul.mubr.f32.gmra.mrb[2].mxu1 %v209_v6 }
 0x216   :  { %v391_v7 = vpop.f32.mrb[0].mxu1 }
 0x217   :  { %v392_v8 = vpop.f32.mrb[1].mxu1 }
 0x218   :  { %v393_v10 = vadd.f32 %v392_v8, %v391_v7 }
 0x21a   :  { %v336_v11 = vadd.f32 %v393_v10, %v358_v9  ;;  %v394_v12 = vpop.f32.mrb[2].mxu1 }
 0x21b   :  { %v395_v13 = vpop.f32.mrb[3].mxu1 }
 0x21c   :  { %338 = vst [vmem:[#allocation9] sm:$0xff] %v336_v11  ;;  %v396_v14 = vadd.f32 %v395_v13, %v394_v12 }
 0x21e   :  { %v337_v15 = vadd.f32 %v396_v14, %v358_v9 }
 0x220   :  { %339 = vst [vmem:[#allocation9 + $0x8] sm:$0xff] %v337_v15 }
 0x221   :  { %555 = shalt.err (!%p552_p0)
}
 0x222   :  { %s556_s12 = scalar_lea.hbm %s681_s5, 256 }
 0x223   :  { %p557_p1 = scmp.ne.s32.totalorder %s681_s5, %s556_s12  ;;  %p560_p2 = scmp.lt.u32.totalorder %s556_s12, %s681_s5 }
 0x225   :  { %p562_p3 = pnand %p560_p2, %p557_p1 }
 0x227   :  { %565 = shalt.err (!%p562_p3)
}
 0x228   :  { %351 = dma.vmem_to_hbm [thread:$0]  %s346_s9, 256, %s681_s5, [#allocation5], %s576_s1, %s576_s1, %s577_s17  }
 0x229   :  { %570 = dma.done.wait [#allocation5], 256  }
 0x22a   :  { %571 = vsyncadd [#allocation5], 4294967040 }
 0x22b   :  { %355 = vsyncpa [#allocation4], 1 }
 0x22c   :  { %356 = vsyncpa [#allocation7], 1 }
 0x22d   :  { %357 = vsyncpa [#allocation5], 1 }

</bundles_post_ra>
